<compile_context>
chip_gen: v5e
topology: v5e:2x2
jax: 0.10.0
libtpu: 0.0.40
codegen_flags: <defaults>
</compile_context>

<pallas_src>
import functools

import jax
import jax.numpy as jnp
from jax.experimental import pallas as pl
from jax.experimental.pallas import tpu as pltpu

LEAKY_SLOPE = 0.2
IN_EPS = 1e-5


def _block_kernel(p_ref, w_ref, o_ref):
    # p_ref: (1, Kp, L) bf16 patches, w_ref: (Cout, Kp) bf16, o_ref: (1, Cout, L).
    # Single-pass bf16 MXU matmul, f32 accumulation.  Output layout (Cout, L)
    # keeps L on the lane axis (lane-dense stores + full-width VPU tail).
    y = jnp.dot(w_ref[...], p_ref[0], preferred_element_type=jnp.float32)

    # Conv2d bias intentionally omitted: InstanceNorm2d(affine=False) subtracts
    # the per-channel spatial mean, so a per-channel bias cancels exactly.

    # InstanceNorm2d: biased variance over spatial (axis=-1), one-pass moments.
    inv_l = 1.0 / y.shape[-1]
    s1 = jnp.sum(y, axis=-1, keepdims=True)
    s2 = jnp.sum(y * y, axis=-1, keepdims=True)
    mean = s1 * inv_l
    var = s2 * inv_l - mean * mean
    y = (y - mean) * jax.lax.rsqrt(var + IN_EPS)

    # LeakyReLU(0.2)
    y = jnp.where(y >= 0, y, LEAKY_SLOPE * y)
    o_ref[0] = y.astype(o_ref.dtype)


def _im2col_nchw(x_nchw, kh, kw, stride, pad):
    """Extract conv patches in NCHW order -> (N, K, L), K ordered (kh, kw, cin)."""
    xp = jnp.pad(x_nchw, ((0, 0), (0, 0), (pad, pad), (pad, pad)))
    n, c, hp, wp = xp.shape
    ho = (hp - kh) // stride + 1
    wo = (wp - kw) // stride + 1
    taps = []
    for i in range(kh):
        for j in range(kw):
            taps.append(
                xp[:, :, i:i + (ho - 1) * stride + 1:stride,
                          j:j + (wo - 1) * stride + 1:stride]
            )  # (N, Cin, Ho, Wo)
    p = jnp.stack(taps, axis=1)                       # (N, KH*KW, Cin, Ho, Wo)
    p = p.reshape(n, kh * kw * c, ho * wo)            # (N, K, L)
    return p, ho, wo


def block_forward(x_nchw, w_oihw, b, *, stride, padding):
    """Block.forward: Conv2d(stride, padding) + InstanceNorm2d + LeakyReLU(0.2).

    x: (N, Cin, H, W) float32, w: (Cout, Cin, KH, KW), b: (Cout,).
    Returns (N, Cout, Ho, Wo) float32.
    """
    del b  # cancelled exactly by InstanceNorm2d(affine=False); see kernel note.
    n, cin, _, _ = x_nchw.shape
    cout, cin_w, kh, kw = w_oihw.shape
    assert cin == cin_w

    patches, ho, wo = _im2col_nchw(x_nchw, kh, kw, stride, padding)
    K = kh * kw * cin
    L = ho * wo
    # Lane-dense requirement for the (Cout, L) block: full-dim or 128-multiple.
    assert L % 128 == 0 or L == ho * wo  # full dim is always legal here

    # Pad K up to a multiple of 8 (sublane tiling); zero rows are inert in the dot.
    Kp = ((K + 7) // 8) * 8
    patches = patches.astype(jnp.bfloat16)
    if Kp != K:
        patches = jnp.pad(patches, ((0, 0), (0, Kp - K), (0, 0)))

    # (Cout, Cin, KH, KW) -> (Cout, KH, KW, Cin) -> (Cout, K): matches the
    # (kh, kw, cin) patch-feature ordering above.  Pad K the same way.
    w_mat = jnp.transpose(w_oihw, (0, 2, 3, 1)).reshape(cout, K).astype(jnp.bfloat16)
    if Kp != K:
        w_mat = jnp.pad(w_mat, ((0, 0), (0, Kp - K)))

    out = pl.pallas_call(
        _block_kernel,
        out_shape=jax.ShapeDtypeStruct((n, cout, L), x_nchw.dtype),
        grid=(n,),
        in_specs=[
            pl.BlockSpec((1, Kp, L), lambda i: (i, 0, 0)),
            pl.BlockSpec((cout, Kp), lambda i: (0, 0)),   # constant block: stays resident
        ],
        out_specs=pl.BlockSpec((1, cout, L), lambda i: (i, 0, 0)),
        compiler_params=pltpu.CompilerParams(dimension_semantics=("parallel",)),
    )(patches, w_mat)

    return out.reshape(n, cout, ho, wo)  # (Cout, L) layout reshapes straight to NCHW


def reference_forward(x, w, b, *, stride, padding):
    """Pure-JAX f32 reference mirroring the PyTorch Block (bias included)."""
    y = jax.lax.conv_general_dilated(
        x, w, (stride, stride), [(padding, padding), (padding, padding)],
        dimension_numbers=("NCHW", "OIHW", "NCHW"),
        precision=jax.lax.Precision.HIGHEST,
    )
    y = y + b[None, :, None, None]
    m = jnp.mean(y, axis=(2, 3), keepdims=True)
    v = jnp.mean((y - m) ** 2, axis=(2, 3), keepdims=True)
    y = (y - m) * jax.lax.rsqrt(v + IN_EPS)
    return jnp.where(y >= 0, y, LEAKY_SLOPE * y)


if __name__ == "__main__":
    key = jax.random.PRNGKey(0)
    kx, kw, kb = jax.random.split(key, 3)

    # Small config: Block(input=4, out=64, kernel_size=4, stride=2, padding=1)
    # on x of shape (2, 4, 32, 32)  ->  (2, 64, 16, 16);  L = 256 (lane-dense).
    N, CIN, H, W = 2, 4, 32, 32
    COUT, KH, KW, STRIDE, PAD = 64, 4, 4, 2, 1

    x = jax.random.normal(kx, (N, CIN, H, W), jnp.float32)
    w = (jax.random.normal(kw, (COUT, CIN, KH, KW), jnp.float32) * 0.05).astype(jnp.float32)
    b = (jax.random.normal(kb, (COUT,), jnp.float32) * 0.01).astype(jnp.float32)

    fwd = jax.jit(functools.partial(block_forward, stride=STRIDE, padding=PAD))
    out = jax.block_until_ready(fwd(x, w, b))
    assert out.shape == (N, COUT, H // 2, W // 2), out.shape

    ref = reference_forward(x, w, b, stride=STRIDE, padding=PAD)
    # bf16 MXU operands (f32 accumulate) vs. f32 HIGHEST reference.
    assert jnp.allclose(out, ref, rtol=2e-2, atol=2e-2), float(jnp.max(jnp.abs(out - ref)))

    print("KERNEL_OK")
</pallas_src>

<mosaic_0001>
module attributes {stable_mosaic.version = 11 : i64} {
  func.func @_block_kernel(%arg0: i32, %arg1: memref<1x64x256xbf16, #tpu.memory_space<vmem>>, %arg2: memref<64x64xbf16, #tpu.memory_space<vmem>>, %arg3: memref<1x64x256xf32, #tpu.memory_space<vmem>>) attributes {dimension_semantics = [#tpu.dimension_semantics<parallel>], iteration_bounds = array<i64: 2>, scalar_prefetch = 0 : i64, scratch_operands = 0 : i64, tpu.core_type = #tpu.core_type<tc>, window_params = [{transform_indices = @transform_0, window_bounds = array<i64: 1, 64, 256>}, {pipeline_mode = #tpu.pipeline_mode<synchronous>, transform_indices = @transform_1, window_bounds = array<i64: 64, 64>}, {transform_indices = @transform_2, window_bounds = array<i64: 1, 64, 256>}]} {
    %c0 = arith.constant 0 : index
    %c0_0 = arith.constant 0 : index
    %0 = vector.load %arg2[%c0, %c0_0] : memref<64x64xbf16, #tpu.memory_space<vmem>>, vector<64x64xbf16>
    %c0_1 = arith.constant 0 : index
    %c0_2 = arith.constant 0 : index
    %c0_3 = arith.constant 0 : index
    %1 = vector.load %arg1[%c0_1, %c0_2, %c0_3] : memref<1x64x256xbf16, #tpu.memory_space<vmem>>, vector<1x64x256xbf16>
    %2 = vector.shape_cast %1 : vector<1x64x256xbf16> to vector<64x256xbf16>
    %cst = arith.constant dense<0.000000e+00> : vector<64x256xf32>
    %3 = tpu.matmul %0, %2, %cst {dimension_numbers = #tpu.dot_dimension_numbers<[1], [0], [0], [1], [0, 0, 1, 1], [], []>} : vector<64x64xbf16>, vector<64x256xbf16>, vector<64x256xf32> -> vector<64x256xf32>
    %cst_4 = arith.constant dense<0.000000e+00> : vector<64xf32>
    %4 = vector.multi_reduction <add>, %3, %cst_4 [1] : vector<64x256xf32> to vector<64xf32>
    %5 = vector.shape_cast %4 : vector<64xf32> to vector<64x1xf32>
    %6 = arith.mulf %3, %3 : vector<64x256xf32>
    %cst_5 = arith.constant dense<0.000000e+00> : vector<64xf32>
    %7 = vector.multi_reduction <add>, %6, %cst_5 [1] : vector<64x256xf32> to vector<64xf32>
    %8 = vector.shape_cast %7 : vector<64xf32> to vector<64x1xf32>
    %cst_6 = arith.constant 3.906250e-03 : f32
    %9 = vector.broadcast %cst_6 : f32 to vector<64x1xf32>
    %10 = arith.mulf %5, %9 : vector<64x1xf32>
    %cst_7 = arith.constant 3.906250e-03 : f32
    %11 = vector.broadcast %cst_7 : f32 to vector<64x1xf32>
    %12 = arith.mulf %8, %11 : vector<64x1xf32>
    %13 = arith.mulf %10, %10 : vector<64x1xf32>
    %14 = arith.subf %12, %13 : vector<64x1xf32>
    %15 = vector.broadcast %10 : vector<64x1xf32> to vector<64x256xf32>
    %16 = arith.subf %3, %15 : vector<64x256xf32>
    %cst_8 = arith.constant 9.99999974E-6 : f32
    %17 = vector.broadcast %cst_8 : f32 to vector<64x1xf32>
    %18 = arith.addf %14, %17 : vector<64x1xf32>
    %19 = math.rsqrt %18 : vector<64x1xf32>
    %20 = vector.broadcast %19 : vector<64x1xf32> to vector<64x256xf32>
    %21 = arith.mulf %16, %20 : vector<64x256xf32>
    %cst_9 = arith.constant 0.000000e+00 : f32
    %22 = vector.broadcast %cst_9 : f32 to vector<64x256xf32>
    %23 = arith.cmpf oge, %21, %22 : vector<64x256xf32>
    %cst_10 = arith.constant 2.000000e-01 : f32
    %24 = vector.broadcast %cst_10 : f32 to vector<64x256xf32>
    %25 = arith.mulf %24, %21 : vector<64x256xf32>
    %26 = arith.select %23, %21, %25 : vector<64x256xi1>, vector<64x256xf32>
    %c0_11 = arith.constant 0 : index
    %c0_12 = arith.constant 0 : index
    %c0_13 = arith.constant 0 : index
    %27 = vector.load %arg3[%c0_11, %c0_12, %c0_13] : memref<1x64x256xf32, #tpu.memory_space<vmem>>, vector<1x64x256xf32>
    %28 = vector.shape_cast %27 : vector<1x64x256xf32> to vector<64x256xf32>
    %29 = vector.shape_cast %26 : vector<64x256xf32> to vector<1x64x256xf32>
    tpu.vector_store %arg3[%c0_11, %c0_12, %c0_13], %29 {strides = array<i32>} : memref<1x64x256xf32, #tpu.memory_space<vmem>>, vector<1x64x256xf32>,
    return
  }
  func.func @transform_0(%arg0: i32) -> (i32, i32, i32) {
    %c0_i32 = arith.constant 0 : i32
    %c0_i32_0 = arith.constant 0 : i32
    %c0_i32_1 = arith.constant 0 : i32
    return %arg0, %c0_i32, %c0_i32_0 : i32, i32, i32
  }
  func.func @transform_1(%arg0: i32) -> (i32, i32) {
    %c0_i32 = arith.constant 0 : i32
    %c0_i32_0 = arith.constant 0 : i32
    %c0_i32_1 = arith.constant 0 : i32
    return %c0_i32, %c0_i32_0 : i32, i32
  }
  func.func @transform_2(%arg0: i32) -> (i32, i32, i32) {
    %c0_i32 = arith.constant 0 : i32
    %c0_i32_0 = arith.constant 0 : i32
    %c0_i32_1 = arith.constant 0 : i32
    return %arg0, %c0_i32, %c0_i32_0 : i32, i32, i32
  }
}

</mosaic_0001>

<bundles_post_ra>
// kernel: block_forward.1
= control target key start
LH: loop header
LB: loop body
LE: loop exit
PB: predicated region body
PF: predicated region fallthrough
CT: control target
= control target key end

     0   :  { %s763_s9 = smov 0   ;;  %s982_s0 = inlined_call_operand.vmem [shape: bf16[2,64,256], index: 0, kind: input, shape index: {}]   ;;  %s983_s1 = inlined_call_operand.vmem [shape: bf16[64,64], index: 1, kind: input, shape index: {}]   ;;  %s984_s2 = inlined_call_operand.vmem [shape: f32[2,64,256], index: 2, kind: output, shape index: {}]  }
   0x1 LB: > { %s627_s10 = sadd.s32 4294967295, %s746_s9   ;;  %p631_p0 = scmp.ge.s32.totalorder %s746_s9, 1  ;;  %s746_s9 = sphi %s763_s9, %s12_s9  }
   0x2   : > { %p112_p1 = scmp.lt.s32.totalorder %s746_s9, 3 }
   0x4   : > { %p113_p2 = pnand %p631_p0, %p112_p1 }
   0x5   : > { %p134_p3 = scmp.lt.s32.totalorder (!%p113_p2), %s627_s10, 1 }
   0x6   : > { %116 = sbr.rel (%p113_p2) target bundleno = 359 (0x167), region = 28 }
   0xb   : > { %s986_s10 = smov (!%p134_p3, %s627_s10), 1  ;;  %v696_v24 = vld [vmem:[%s983_s1] sm:$0xff]  ;;  %v698_v25 = vld [vmem:[%s983_s1 + $0x10] sm:$0xff]  ;;  %vm221_vm0 = vcmask 523264   ;;  %v697_v26 = vld [vmem:[%s983_s1 + $0x8] sm:$0xff] }
   0xc   : > { %s694_s11 = sshll.u32 %s986_s10, 6  ;;  %v699_v27 = vld [vmem:[%s983_s1 + $0x18] sm:$0xff]  ;;  %s695_s23 = sshll.u32 %s986_s10, 7 }
   0xd   : > { %s138_s14 = scalar_lea.vmem %s982_s0, %s694_s11  ;;  %s889_s26 = scalar_lea.vmem %s984_s2, %s695_s23 }
   0xe   : > { %v678_v0 = vld [vmem:[%s138_s14 + $0x30] sm:$0xf]  ;;  %v707_v1 = vld [vmem:[%s138_s14 + $0x34] sm:$0xf0]  ;;  %v706_v2 = vld [vmem:[%s138_s14 + $0x34] sm:$0xf] }
   0xf   : > { %v679_v3 = vor.u32 %v707_v1, %v678_v0  ;;  %v680_v4 = vld [vmem:[%s138_s14 + $0x38] sm:$0xf0]  ;;  %v670_v5 = vld [vmem:[%s138_s14 + $0x20] sm:$0xf]  ;;  %v705_v6 = vld [vmem:[%s138_s14 + $0x24] sm:$0xf0] }
  0x10   : > { %v683_v7 = vor.u32 %v706_v2, %v680_v4  ;;  %v704_v8 = vld [vmem:[%s138_s14 + $0x24] sm:$0xf]  ;;  %v672_v9 = vld [vmem:[%s138_s14 + $0x28] sm:$0xf0]  ;;  %v671_v10 = vor.u32 %v705_v6, %v670_v5  ;;  %v662_v12 = vld [vmem:[%s138_s14 + $0x10] sm:$0xf] }
  0x11   : > { %238 = vmatpush.bf16.msra.mxu0 %v679_v3  ;;  %708 = vmatpush.bf16.msra.mxu2 %v679_v3  ;;  %v675_v11 = vor.u32 %v704_v8, %v672_v9  ;;  %v703_v13 = vld [vmem:[%s138_s14 + $0x14] sm:$0xf0]  ;;  %v702_v14 = vld [vmem:[%s138_s14 + $0x14] sm:$0xf]  ;;  %v664_v15 = vld [vmem:[%s138_s14 + $0x18] sm:$0xf0] }
  0x12   : > { %267 = vmatpush.bf16.msra.mxu1 %v683_v7  ;;  %712 = vmatpush.bf16.msra.mxu3 %v683_v7  ;;  %v663_v16 = vor.u32 %v703_v13, %v662_v12  ;;  %v667_v17 = vor.u32 %v702_v14, %v664_v15  ;;  %v654_v18 = vld [vmem:[%s138_s14] sm:$0xf]  ;;  %v701_v19 = vld [vmem:[%s138_s14 + $0x4] sm:$0xf0]  ;;  %v700_v20 = vld [vmem:[%s138_s14 + $0x4] sm:$0xf] }
  0x13   : > { %v656_v21 = vld [vmem:[%s138_s14 + $0x8] sm:$0xf0]  ;;  %v655_v22 = vor.u32 %v701_v19, %v654_v18 }
  0x14   : > { %v659_v23 = vor.u32 %v700_v20, %v656_v21 }
  0x15   : > { %239 = vmatpush.bf16.msra.mxu0 %v671_v10  ;;  %709 = vmatpush.bf16.msra.mxu2 %v671_v10 }
  0x16   : > { %268 = vmatpush.bf16.msra.mxu1 %v675_v11  ;;  %713 = vmatpush.bf16.msra.mxu3 %v675_v11 }
  0x19   : > { %240 = vmatpush.bf16.msra.mxu0 %v663_v16  ;;  %710 = vmatpush.bf16.msra.mxu2 %v663_v16 }
  0x1a   : > { %269 = vmatpush.bf16.msra.mxu1 %v667_v17  ;;  %714 = vmatpush.bf16.msra.mxu3 %v667_v17 }
  0x1d   : > { %241 = vmatpush.bf16.msra.mxu0 %v655_v22  ;;  %711 = vmatpush.bf16.msra.mxu2 %v655_v22 }
  0x1e   : > { %270 = vmatpush.bf16.msra.mxu1 %v659_v23  ;;  %715 = vmatpush.bf16.msra.mxu3 %v659_v23 }
  0x20   : > { %684 = vmatmul.msk.bf16.vlgmr.msra.gmra.mxu0 %vm221_vm0, %v696_v24  ;;  %686 = vmatmul.msk.bf16.vlgmr.msra.gmra.mxu2 %vm221_vm0, %v698_v25 }
  0x21   : > { %688 = vmatmul.msk.bf16.vlgmr.msra.gmra.mxu1 %vm221_vm0, %v696_v24  ;;  %690 = vmatmul.msk.bf16.vlgmr.msra.gmra.mxu3 %vm221_vm0, %v698_v25 }
  0x30   : > { %685 = vmatmul.msk.bf16.gmra.mxu0 %vm221_vm0, %v697_v26  ;;  %687 = vmatmul.msk.bf16.gmra.mxu2 %vm221_vm0, %v699_v27 }
  0x31   : > { %689 = vmatmul.msk.bf16.gmra.mxu1 %vm221_vm0, %v697_v26  ;;  %691 = vmatmul.msk.bf16.gmra.mxu3 %vm221_vm0, %v699_v27 }
  0x9d   : > { %v789_v28 = vpop.f32.mrf.mxu0 }
  0x9e   : > { %v791_v29 = vpop.f32.mrf.mxu1  ;;  %v316_v30 = vmul.f32 %v789_v28, %v789_v28 }
  0x9f   : > { %v292_v31 = vadd.f32 %v791_v29, %v789_v28  ;;  %v317_v32 = vmul.f32 %v791_v29, %v791_v29 }
  0xa1   : > { %293 = vadd.xlane.f32.xlu0 %v292_v31  ;;  %v332_v33 = vadd.f32 %v317_v32, %v316_v30 }
  0xa3   : > { %333 = vadd.xlane.f32.xlu2 %v332_v33  ;;  %v799_v34 = vpop.f32.mrf.mxu2 }
  0xa4   : > { %v801_v35 = vpop.f32.mrf.mxu3  ;;  %v324_v40 = vmul.f32 %v799_v34, %v799_v34 }
  0xa5   : > { %v803_v36 = vpop.f32.mrf.mxu0  ;;  %v304_v39 = vadd.f32 %v801_v35, %v799_v34  ;;  %v325_v41 = vmul.f32 %v801_v35, %v801_v35 }
  0xa6   : > { %v805_v37 = vpop.f32.mrf.mxu1  ;;  %v318_v49 = vmul.f32 %v803_v36, %v803_v36 }
  0xa7   : > { %v295_v38 = vadd.f32 %v805_v37, %v803_v36  ;;  %v344_v45 = vadd.f32 %v325_v41, %v324_v40  ;;  %v319_v50 = vmul.f32 %v805_v37, %v805_v37 }
  0xa9   : > { %296 = vadd.xlane.f32.xlu0 %v295_v38  ;;  %v335_v59 = vadd.f32 %v319_v50, %v318_v49 }
  0xab   : > { %305 = vadd.xlane.f32.xlu2 %v304_v39  ;;  %v815_v42 = vpop.f32.mrf.mxu2 }
  0xac   : > { %v817_v43 = vpop.f32.mrf.mxu3  ;;  %v326_v9 = vmul.f32 %v815_v42, %v815_v42 }
  0xad   : > { %v819_v44 = vpop.f32.mrf.mxu0  ;;  %v307_v48 = vadd.f32 %v817_v43, %v815_v42  ;;  %v327_v10 = vmul.f32 %v817_v43, %v817_v43 }
  0xae   : > { %v821_v46 = vpop.f32.mrf.mxu1  ;;  %v320_v51 = vmul.f32 %v819_v44, %v819_v44 }
  0xaf   : > { %v298_v47 = vadd.f32 %v821_v46, %v819_v44  ;;  %v321_v52 = vmul.f32 %v821_v46, %v821_v46  ;;  %v347_v11 = vadd.f32 %v327_v10, %v326_v9 }
  0xb1   : > { %345 = vadd.xlane.f32.xlu0 %v344_v45  ;;  %299 = vadd.xlane.f32.xlu1 %v298_v47  ;;  %v338_v60 = vadd.f32 %v321_v52, %v320_v51 }
  0xb3   : > { %308 = vadd.xlane.f32.xlu2 %v307_v48  ;;  %v837_v54 = vpop.f32.mrf.mxu2 }
  0xb4   : > { %v843_v57 = vpop.f32.mrf.mxu3  ;;  %v328_v62 = vmul.f32 %v837_v54, %v837_v54 }
  0xb5   : > { %v835_v53 = vpop.f32.mrf.mxu0  ;;  %v329_v63 = vmul.f32 %v843_v57, %v843_v57  ;;  %v310_v0 = vadd.f32 %v843_v57, %v837_v54 }
  0xb6   : > { %v322_v55 = vmul.f32 %v835_v53, %v835_v53  ;;  %v841_v56 = vpop.f32.mrf.mxu1 }
  0xb7   : > { %v323_v58 = vmul.f32 %v841_v56, %v841_v56  ;;  %v301_v1 = vadd.f32 %v841_v56, %v835_v53  ;;  %v350_v2 = vadd.f32 %v329_v63, %v328_v62 }
  0xb9   : > { %336 = vadd.xlane.f32.xlu0 %v335_v59  ;;  %339 = vadd.xlane.f32.xlu1 %v338_v60  ;;  %v341_v61 = vadd.f32 %v323_v58, %v322_v55 }
  0xbb   : > { %342 = vadd.xlane.f32.xlu2 %v341_v61  ;;  %v855_v3 = vpop.f32.mrf.mxu2 }
  0xbc   : > { %v857_v4 = vpop.f32.mrf.mxu3  ;;  %v330_v5 = vmul.f32 %v855_v3, %v855_v3 }
  0xbd   : > { %v331_v6 = vmul.f32 %v857_v4, %v857_v4  ;;  %v313_v8 = vadd.f32 %v857_v4, %v855_v3 }
  0xbf   : > { %v353_v7 = vadd.f32 %v331_v6, %v330_v5 }
  0xc1   : > { %311 = vadd.xlane.f32.xlu0 %v310_v0  ;;  %302 = vadd.xlane.f32.xlu1 %v301_v1 }
  0xc3   : > { %351 = vadd.xlane.f32.xlu2 %v350_v2 }
  0xc9   : > { %354 = vadd.xlane.f32.xlu0 %v353_v7  ;;  %314 = vadd.xlane.f32.xlu1 %v313_v8 }
  0xd1   : > { %348 = vadd.xlane.f32.xlu1 %v347_v11 }
 0x114   : > { %v294_v12 = vpop.xlane.xlu0 %293 }
 0x115   : > { %v356_v13 = vmul.f32 0.00390625, %v294_v12 }
 0x116   : > { %v334_v14 = vpop.xlane.xlu2 %333 }
 0x117   : > { %v364_v15 = vmul.f32 0.00390625, %v334_v14  ;;  %v372_v16 = vmul.f32 %v356_v13, %v356_v13  ;;  %v388_v45 = vsub.f32 %v789_v28, %v356_v13  ;;  %v389_v47 = vsub.f32 %v791_v29, %v356_v13 }
 0x119   : > { %v380_v17 = vsub.f32 %v364_v15, %v372_v16 }
 0x11b   : > { %v404_v18 = vadd.f32 1e-05, %v380_v17 }
 0x11c   : > { %v297_v19 = vpop.xlane.xlu0 %296 }
 0x11d   : > { %724 = vrsqrt.f32 %v404_v18  ;;  %v875_v38 = vmul.f32 0.00390625, %v297_v19  ;;  %vm418_vm2 = vweird.f32 %v404_v18 }
 0x11e   : > { %v306_v20 = vpop.xlane.xlu2 %305 }
 0x11f   : > { %v869_v21 = vmul.f32 0.00390625, %v306_v20  ;;  %v373_v51 = vmul.f32 %v875_v38, %v875_v38 }
 0x121   : > { %v376_v23 = vmul.f32 %v869_v21, %v869_v21 }
 0x123   : > { %v725_v22 = vpop.eup %724 }
 0x124   : > { %v413_v24 = vmul.f32 %v725_v22, %v404_v18  ;;  %v346_v25 = vpop.xlane.xlu0 %345  ;;  %v300_v26 = vpop.xlane.xlu1 %299  ;;  %vm419_vm1 = vweird.f32 %v725_v22 }
 0x125   : > { %v368_v27 = vmul.f32 0.00390625, %v346_v25  ;;  %v877_v40 = vmul.f32 0.00390625, %v300_v26  ;;  %vm420_vm3 = vmor %vm418_vm2, %vm419_vm1 }
 0x126   : > { %v414_v30 = vmul.f32 %v725_v22, %v413_v24  ;;  %v873_v31 = vpop.xlane.xlu2 %308 }
 0x127   : > { %v384_v32 = vsub.f32 %v368_v27, %v376_v23  ;;  %v374_v55 = vmul.f32 %v877_v40, %v877_v40  ;;  %v396_v27 = vsub.f32 %v799_v34, %v869_v21  ;;  %v390_v34 = vsub.f32 %v803_v36, %v875_v38 }
 0x128   : > { %v415_v33 = vmul.f32 0.5, %v414_v30  ;;  %v397_v30 = vsub.f32 %v801_v35, %v869_v21  ;;  %v926_v36 = vmul.f32 0.00390625, %v873_v31 }
 0x129   : > { %v408_v39 = vadd.f32 1e-05, %v384_v32 }
 0x12a   : > { %v416_v41 = vsub.f32 1.5, %v415_v33 }
 0x12b   : > { %726 = vrsqrt.f32 %v408_v39  ;;  %vm458_vm7 = vweird.f32 %v408_v39 }
 0x12c   : > { %v417_v48 = vmul.f32 %v725_v22, %v416_v41  ;;  %v337_v49 = vpop.xlane.xlu0 %336  ;;  %v340_v50 = vpop.xlane.xlu1 %339 }
 0x12d   : > { %v365_v52 = vmul.f32 0.00390625, %v337_v49  ;;  %v366_v58 = vmul.f32 0.00390625, %v340_v50 }
 0x12e   : > { %v421_v59 = vsel %vm420_vm3, %v725_v22, %v417_v48  ;;  %v343_v60 = vpop.xlane.xlu2 %342 }
 0x12f   : > { %v492_v61 = vmul.f32 %v421_v59, %v388_v45  ;;  %v493_v28 = vmul.f32 %v421_v59, %v389_v47  ;;  %v381_v62 = vsub.f32 %v365_v52, %v373_v51  ;;  %v382_v29 = vsub.f32 %v366_v58, %v374_v55 }
 0x130   : > { %v367_v16 = vmul.f32 0.00390625, %v343_v60  ;;  %v391_v52 = vsub.f32 %v805_v37, %v875_v38  ;;  %v392_v37 = vsub.f32 %v819_v44, %v877_v40  ;;  %v393_v38 = vsub.f32 %v821_v46, %v877_v40 }
 0x131   : > { %v727_v63 = vpop.eup %726  ;;  %vm508_vm4 = vcmp.ge.f32.partialorder %v492_v61, 0.0  ;;  %vm509_vm5 = vcmp.ge.f32.partialorder %v493_v28, 0.0  ;;  %v524_v0 = vmul.f32 0.2, %v492_v61  ;;  %v525_v1 = vmul.f32 0.2, %v493_v28 }
 0x132   : > { %v453_v2 = vmul.f32 %v727_v63, %v408_v39  ;;  %v891_v5 = vadd.f32 1e-05, %v381_v62  ;;  %v893_v6 = vadd.f32 1e-05, %v382_v29  ;;  %vm459_vm6 = vweird.f32 %v727_v63 }
 0x133   : > { %v540_v7 = vsel %vm508_vm4, %v492_v61, %v524_v0  ;;  %v541_v8 = vsel %vm509_vm5, %v493_v28, %v525_v1  ;;  %vm460_vm8 = vmor %vm458_vm7, %vm459_vm6  ;;  %v377_v46 = vmul.f32 %v926_v36, %v926_v36 }
 0x134   : > { %556 = vst [vmem:[%s889_s26] sm:$0xff] %v540_v7  ;;  %v454_v9 = vmul.f32 %v727_v63, %v453_v2  ;;  %728 = vrsqrt.f32 %v891_v5  ;;  %v312_v10 = vpop.xlane.xlu0 %311  ;;  %v303_v11 = vpop.xlane.xlu1 %302  ;;  %vm428_vm13 = vweird.f32 %v891_v5  ;;  %vm438_vm15 = vweird.f32 %v893_v6 }
 0x135   : > { %557 = vst [vmem:[%s889_s26 + $0x8] sm:$0xff] %v541_v8  ;;  %730 = vrsqrt.f32 %v893_v6  ;;  %v899_v12 = vmul.f32 0.00390625, %v312_v10  ;;  %v901_v13 = vmul.f32 0.00390625, %v303_v11 }
 0x136   : > { %v455_v14 = vmul.f32 0.5, %v454_v9  ;;  %v352_v15 = vpop.xlane.xlu2 %351 }
 0x137   : > { %v375_v17 = vmul.f32 %v901_v13, %v901_v13  ;;  %v378_v19 = vmul.f32 %v899_v12, %v899_v12  ;;  %v370_v20 = vmul.f32 0.00390625, %v352_v15 }
 0x138   : > { %v456_v18 = vsub.f32 1.5, %v455_v14 }
 0x139   : > { %v383_v22 = vsub.f32 %v367_v16, %v375_v17  ;;  %v386_v25 = vsub.f32 %v370_v20, %v378_v19 }
 0x13a   : > { %v729_v23 = vpop.eup %728  ;;  %v457_v24 = vmul.f32 %v727_v63, %v456_v18 }
 0x13b   : > { %v731_v26 = vpop.eup %730  ;;  %v423_v32 = vmul.f32 %v729_v23, %v891_v5  ;;  %v912_v33 = vadd.f32 1e-05, %v383_v22  ;;  %v915_v47 = vadd.f32 1e-05, %v386_v25  ;;  %vm429_vm11 = vweird.f32 %v729_v23 }
 0x13c   : > { %v461_v41 = vsel %vm460_vm8, %v727_v63, %v457_v24  ;;  %v433_v45 = vmul.f32 %v731_v26, %v893_v6  ;;  %v315_v48 = vpop.xlane.xlu1 %314  ;;  %v355_v59 = vpop.xlane.xlu0 %354  ;;  %vm439_vm12 = vweird.f32 %v731_v26  ;;  %vm430_vm14 = vmor %vm428_vm13, %vm429_vm11 }
 0x13d   : > { %v500_v39 = vmul.f32 %v461_v41, %v396_v27  ;;  %v501_v49 = vmul.f32 %v461_v41, %v397_v30  ;;  %v424_v50 = vmul.f32 %v729_v23, %v423_v32  ;;  %732 = vrsqrt.f32 %v912_v33  ;;  %vm440_vm0 = vmor %vm438_vm15, %vm439_vm12 }
 0x13e   : > { %v434_v35 = vmul.f32 %v731_v26, %v433_v45  ;;  %734 = vrsqrt.f32 %v915_v47  ;;  %v923_v60 = vmul.f32 0.00390625, %v315_v48  ;;  %v371_v31 = vmul.f32 0.00390625, %v355_v59 }
 0x13f   : > { %vm516_vm9 = vcmp.ge.f32.partialorder %v500_v39, 0.0  ;;  %vm517_vm10 = vcmp.ge.f32.partialorder %v501_v49, 0.0  ;;  %v532_v21 = vmul.f32 0.2, %v500_v39  ;;  %v533_v51 = vmul.f32 0.2, %v501_v49 }
 0x140   : > { %v425_v55 = vmul.f32 0.5, %v424_v50  ;;  %v435_v58 = vmul.f32 0.5, %v434_v35  ;;  %v379_v63 = vmul.f32 %v923_v60, %v923_v60  ;;  %vm448_vm6 = vweird.f32 %v912_v33 }
 0x141   : > { %v548_v61 = vsel %vm516_vm9, %v500_v39, %v532_v21  ;;  %v549_v28 = vsel %vm517_vm10, %v501_v49, %v533_v51  ;;  %v395_v35 = vsub.f32 %v841_v56, %v901_v13  ;;  %vm478_vm9 = vweird.f32 %v915_v47 }
 0x142   : > { %564 = vst [vmem:[%s889_s26 + $0x40] sm:$0xff] %v548_v61  ;;  %v426_v62 = vsub.f32 1.5, %v425_v55  ;;  %v436_v29 = vsub.f32 1.5, %v435_v58  ;;  %v387_v44 = vsub.f32 %v371_v31, %v379_v63  ;;  %v400_v55 = vsub.f32 %v837_v54, %v899_v12 }
 0x143   : > { %v733_v0 = vpop.eup %732  ;;  %565 = vst [vmem:[%s889_s26 + $0x48] sm:$0xff] %v549_v28 }
 0x144   : > { %v735_v1 = vpop.eup %734  ;;  %v427_v2 = vmul.f32 %v729_v23, %v426_v62  ;;  %v437_v7 = vmul.f32 %v731_v26, %v436_v29  ;;  %v443_v8 = vmul.f32 %v733_v0, %v912_v33  ;;  %v349_v9 = vpop.xlane.xlu1 %348  ;;  %vm449_vm1 = vweird.f32 %v733_v0 }
 0x145   : > { %v473_v10 = vmul.f32 %v735_v1, %v915_v47  ;;  %v369_v40 = vmul.f32 0.00390625, %v349_v9  ;;  %v943_v20 = vadd.f32 1e-05, %v387_v44  ;;  %vm479_vm7 = vweird.f32 %v735_v1  ;;  %vm450_vm8 = vmor %vm448_vm6, %vm449_vm1 }
 0x146   : > { %v431_v5 = vsel %vm430_vm14, %v729_v23, %v427_v2  ;;  %v441_v11 = vsel %vm440_vm0, %v731_v26, %v437_v7  ;;  %v444_v14 = vmul.f32 %v733_v0, %v443_v8  ;;  %vm480_vm10 = vmor %vm478_vm9, %vm479_vm7  ;;  %v402_v9 = vsub.f32 %v855_v3, %v923_v60 }
 0x147   : > { %v494_v15 = vmul.f32 %v431_v5, %v390_v34  ;;  %v495_v16 = vmul.f32 %v431_v5, %v391_v52  ;;  %v496_v17 = vmul.f32 %v441_v11, %v392_v37  ;;  %v497_v6 = vmul.f32 %v441_v11, %v393_v38 }
 0x148   : > { %v445_v18 = vmul.f32 0.5, %v444_v14  ;;  %v474_v19 = vmul.f32 %v735_v1, %v473_v10  ;;  %v385_v22 = vsub.f32 %v369_v40, %v377_v46  ;;  %736 = vrsqrt.f32 %v943_v20 }
 0x149   : > { %vm510_vm2 = vcmp.ge.f32.partialorder %v494_v15, 0.0  ;;  %vm511_vm3 = vcmp.ge.f32.partialorder %v495_v16, 0.0  ;;  %v526_v24 = vmul.f32 0.2, %v494_v15  ;;  %v527_v25 = vmul.f32 0.2, %v495_v16 }
 0x14a   : > { %vm512_vm4 = vcmp.ge.f32.partialorder %v496_v17, 0.0  ;;  %vm513_vm5 = vcmp.ge.f32.partialorder %v497_v6, 0.0  ;;  %v528_v23 = vmul.f32 0.2, %v496_v17  ;;  %v529_v26 = vmul.f32 0.2, %v497_v6 }
 0x14b   : > { %v542_v27 = vsel %vm510_vm2, %v494_v15, %v526_v24  ;;  %v543_v30 = vsel %vm511_vm3, %v495_v16, %v527_v25  ;;  %v446_v32 = vsub.f32 1.5, %v445_v18  ;;  %v475_v41 = vmul.f32 0.5, %v474_v19 }
 0x14c   : > { %558 = vst [vmem:[%s889_s26 + $0x10] sm:$0xff] %v542_v27  ;;  %v544_v45 = vsel %vm512_vm4, %v496_v17, %v528_v23  ;;  %v545_v48 = vsel %vm513_vm5, %v497_v6, %v529_v26  ;;  %v409_v50 = vadd.f32 1e-05, %v385_v22  ;;  %v394_v34 = vsub.f32 %v835_v53, %v901_v13 }
 0x14d   : > { %559 = vst [vmem:[%s889_s26 + $0x18] sm:$0xff] %v543_v30  ;;  %v447_v39 = vmul.f32 %v733_v0, %v446_v32  ;;  %v476_v49 = vsub.f32 1.5, %v475_v41  ;;  %v401_v53 = vsub.f32 %v843_v57, %v899_v12  ;;  %vm488_vm0 = vweird.f32 %v943_v20 }
 0x14e   : > { %560 = vst [vmem:[%s889_s26 + $0x20] sm:$0xff] %v544_v45  ;;  %738 = vrsqrt.f32 %v409_v50  ;;  %v737_v56 = vpop.eup %736  ;;  %v403_v10 = vsub.f32 %v857_v4, %v923_v60  ;;  %v398_v14 = vsub.f32 %v815_v42, %v926_v36  ;;  %v399_v15 = vsub.f32 %v817_v43, %v926_v36 }
 0x14f   : > { %561 = vst [vmem:[%s889_s26 + $0x28] sm:$0xff] %v545_v48  ;;  %v451_v21 = vsel %vm450_vm8, %v733_v0, %v447_v39  ;;  %v477_v51 = vmul.f32 %v735_v1, %v476_v49  ;;  %v483_v28 = vmul.f32 %v737_v56, %v943_v20  ;;  %vm489_vm15 = vweird.f32 %v737_v56 }
 0x150   : > { %v498_v33 = vmul.f32 %v451_v21, %v394_v34  ;;  %v499_v52 = vmul.f32 %v451_v21, %v395_v35  ;;  %vm490_vm1 = vmor %vm488_vm0, %vm489_vm15  ;;  %vm468_vm3 = vweird.f32 %v409_v50 }
 0x151   : > { %v481_v58 = vsel %vm480_vm10, %v735_v1, %v477_v51  ;;  %v484_v57 = vmul.f32 %v737_v56, %v483_v28 }
 0x152   : > { %vm514_vm11 = vcmp.ge.f32.partialorder %v498_v33, 0.0  ;;  %vm515_vm12 = vcmp.ge.f32.partialorder %v499_v52, 0.0  ;;  %v530_v13 = vmul.f32 0.2, %v498_v33  ;;  %v531_v59 = vmul.f32 0.2, %v499_v52 }
 0x153   : > { %v504_v61 = vmul.f32 %v481_v58, %v400_v55  ;;  %v505_v47 = vmul.f32 %v481_v58, %v401_v53  ;;  %v485_v38 = vmul.f32 0.5, %v484_v57 }
 0x154   : > { %v546_v62 = vsel %vm514_vm11, %v498_v33, %v530_v13  ;;  %v547_v29 = vsel %vm515_vm12, %v499_v52, %v531_v59  ;;  %v739_v63 = vpop.eup %738 }
 0x155   : > { %562 = vst [vmem:[%s889_s26 + $0x30] sm:$0xff] %v546_v62  ;;  %vm520_vm13 = vcmp.ge.f32.partialorder %v504_v61, 0.0  ;;  %vm521_vm14 = vcmp.ge.f32.partialorder %v505_v47, 0.0  ;;  %v536_v54 = vmul.f32 0.2, %v504_v61  ;;  %v463_v0 = vmul.f32 %v739_v63, %v409_v50 }
 0x156   : > { %563 = vst [vmem:[%s889_s26 + $0x38] sm:$0xff] %v547_v29  ;;  %v537_v12 = vmul.f32 0.2, %v505_v47  ;;  %v486_v2 = vsub.f32 1.5, %v485_v38  ;;  %vm469_vm2 = vweird.f32 %v739_v63 }
 0x157   : > { %v552_v37 = vsel %vm520_vm13, %v504_v61, %v536_v54  ;;  %v464_v1 = vmul.f32 %v739_v63, %v463_v0  ;;  %vm470_vm6 = vmor %vm468_vm3, %vm469_vm2 }
 0x158   : > { %v553_v31 = vsel %vm521_vm14, %v505_v47, %v537_v12  ;;  %568 = vst [vmem:[%s889_s26 + $0x60] sm:$0xff] %v552_v37  ;;  %v487_v8 = vmul.f32 %v737_v56, %v486_v2 }
 0x159   : > { %569 = vst [vmem:[%s889_s26 + $0x68] sm:$0xff] %v553_v31  ;;  %v465_v7 = vmul.f32 0.5, %v464_v1 }
 0x15a   : > { %v491_v46 = vsel %vm490_vm1, %v737_v56, %v487_v8 }
 0x15b   : > { %v466_v44 = vsub.f32 1.5, %v465_v7  ;;  %v506_v40 = vmul.f32 %v491_v46, %v402_v9  ;;  %v507_v5 = vmul.f32 %v491_v46, %v403_v10 }
 0x15d   : > { %v467_v11 = vmul.f32 %v739_v63, %v466_v44  ;;  %vm522_vm4 = vcmp.ge.f32.partialorder %v506_v40, 0.0  ;;  %vm523_vm5 = vcmp.ge.f32.partialorder %v507_v5, 0.0  ;;  %v538_v3 = vmul.f32 0.2, %v506_v40 }
 0x15e   : > { %v539_v4 = vmul.f32 0.2, %v507_v5 }
 0x15f   : > { %v471_v60 = vsel %vm470_vm6, %v739_v63, %v467_v11  ;;  %v554_v16 = vsel %vm522_vm4, %v506_v40, %v538_v3 }
 0x160   : > { %v555_v17 = vsel %vm523_vm5, %v507_v5, %v539_v4  ;;  %v502_v6 = vmul.f32 %v471_v60, %v398_v14  ;;  %v503_v18 = vmul.f32 %v471_v60, %v399_v15  ;;  %570 = vst [vmem:[%s889_s26 + $0x70] sm:$0xff] %v554_v16 }
 0x161   : > { %571 = vst [vmem:[%s889_s26 + $0x78] sm:$0xff] %v555_v17 }
 0x162   : > { %vm518_vm7 = vcmp.ge.f32.partialorder %v502_v6, 0.0  ;;  %vm519_vm8 = vcmp.ge.f32.partialorder %v503_v18, 0.0  ;;  %v534_v42 = vmul.f32 0.2, %v502_v6  ;;  %v535_v19 = vmul.f32 0.2, %v503_v18 }
 0x164   : > { %v550_v43 = vsel %vm518_vm7, %v502_v6, %v534_v42  ;;  %v551_v36 = vsel %vm519_vm8, %v503_v18, %v535_v19 }
 0x165   : > { %566 = vst [vmem:[%s889_s26 + $0x50] sm:$0xff] %v550_v43 }
 0x166   : > { %567 = vst [vmem:[%s889_s26 + $0x58] sm:$0xff] %v551_v36 }
 0x167 PF: > { %s12_s9 = sadd.s32 1, %s746_s9  }
 0x168   : > { %p9_p4 = scmp.ge.s32.totalorder %s12_s9, 4  }
 0x16a   :  { %11 = sbr.rel (!%p9_p4) target bundleno = 1 (0x1), region = 58 }

</bundles_post_ra>
